<compile_context>
chip_gen: v7x
topology: tpu7x:2x2x1
jax: 0.10.0
libtpu: 0.0.40
codegen_flags: <defaults>
</compile_context>

<pallas_src>
import functools

import jax
import jax.numpy as jnp
from jax.experimental import pallas as pl
from jax.experimental.pallas import tpu as pltpu


# ---------------------------------------------------------------------------
# Fused kernel: Linear(+bias) -> ReLU -> Linear(+bias) -> Sigmoid
# ---------------------------------------------------------------------------
def _domain_classifier_kernel(x_ref, w1_ref, b1_ref, w2t_ref, b2_ref, o_ref):
    # fc1 + ReLU  (MXU matmul, f32 accumulation; h never leaves VMEM/vregs)
    h = jnp.dot(x_ref[...], w1_ref[...], preferred_element_type=jnp.float32)
    h = jnp.maximum(h + b1_ref[...], 0.0)
    # fc2 (output width 1): broadcast-multiply by W2^T (1, hidden) and reduce
    # over the lane axis -> (BT, 1).  Avoids a padded MXU pass and a padded
    # HBM store entirely.
    y = jnp.sum(h * w2t_ref[...], axis=-1, keepdims=True) + b2_ref[...]
    # Sigmoid on the real (BT, 1) column only; exp goes to the EUP slot.
    o_ref[...] = 1.0 / (1.0 + jnp.exp(-y))


# ---------------------------------------------------------------------------
# Parameters (torch.nn.Linear default uniform init, weights stored as (in, out))
# ---------------------------------------------------------------------------
def init_params(key, input_size=128, hidden_size=64, output_size=1):
    k1, k2, k3, k4 = jax.random.split(key, 4)
    bnd1 = 1.0 / jnp.sqrt(jnp.float32(input_size))
    bnd2 = 1.0 / jnp.sqrt(jnp.float32(hidden_size))
    return {
        "W1": jax.random.uniform(k1, (input_size, hidden_size), jnp.float32, -bnd1, bnd1),
        "b1": jax.random.uniform(k2, (1, hidden_size), jnp.float32, -bnd1, bnd1),
        "W2": jax.random.uniform(k3, (hidden_size, output_size), jnp.float32, -bnd2, bnd2),
        "b2": jax.random.uniform(k4, (1, output_size), jnp.float32, -bnd2, bnd2),
    }


def prepare_params(params):
    """One-time prep hoisted out of the hot path: store fc2 weight transposed
    as (output_size, hidden) so the kernel does a broadcast-multiply + lane
    reduction instead of a 1-column (or 128-padded) matmul."""
    assert params["W2"].shape[1] == 1, "kernel is specialized for output_size=1"
    return {
        "W1": params["W1"],          # (in, hidden)
        "b1": params["b1"],          # (1, hidden)
        "W2T": params["W2"].T,       # (1, hidden)
        "b2": params["b2"],          # (1, 1)
    }


# ---------------------------------------------------------------------------
# Forward: batch-tiled, pipelined pallas_call
# ---------------------------------------------------------------------------
@functools.partial(jax.jit, static_argnames=("block_rows",))
def _forward(x, w1, b1, w2t, b2, block_rows):
    n, k = x.shape
    kh = w1.shape[1]
    out = b2.shape[1]
    grid = (n // block_rows,)

    flops = 2 * n * (k * kh + kh * out)
    bytes_accessed = 4 * (n * k + k * kh + kh + kh * out + out + n * out)

    return pl.pallas_call(
        _domain_classifier_kernel,
        out_shape=jax.ShapeDtypeStruct((n, out), jnp.float32),
        grid=grid,
        in_specs=[
            pl.BlockSpec((block_rows, k), lambda i: (i, 0)),   # x: tiled over batch
            pl.BlockSpec((k, kh), lambda i: (0, 0)),           # W1: resident in VMEM
            pl.BlockSpec((1, kh), lambda i: (0, 0)),           # b1: resident
            pl.BlockSpec((out, kh), lambda i: (0, 0)),         # W2^T: resident
            pl.BlockSpec((1, out), lambda i: (0, 0)),          # b2: resident
        ],
        out_specs=pl.BlockSpec((block_rows, out), lambda i: (i, 0)),
        compiler_params=pltpu.CompilerParams(
            dimension_semantics=("parallel",),   # megacore sharding on v7x
        ),
        cost_estimate=pl.CostEstimate(
            flops=flops, transcendentals=n * out, bytes_accessed=bytes_accessed),
    )(x, w1, b1, w2t, b2)


def domain_classifier_forward(x, prepared, block_rows=512):
    """sigmoid(relu(x @ W1 + b1) @ W2 + b2), batch-tiled Pallas kernel."""
    n = x.shape[0]
    bt = min(block_rows, n)
    bt = max(8, ((bt + 7) // 8) * 8)            # sublane-aligned tile rows
    n_pad = ((n + bt - 1) // bt) * bt
    xp = jnp.pad(x, ((0, n_pad - n), (0, 0))) if n_pad != n else x
    y = _forward(xp, prepared["W1"], prepared["b1"], prepared["W2T"],
                 prepared["b2"], bt)
    return y[:n] if n_pad != n else y


# ---------------------------------------------------------------------------
if __name__ == "__main__":
    input_size, hidden_size, output_size = 128, 64, 1
    batch = 8

    key = jax.random.PRNGKey(0)
    kx, kp = jax.random.split(key)

    x = jax.random.normal(kx, (batch, input_size), jnp.float32)
    params = init_params(kp, input_size, hidden_size, output_size)
    prepared = prepare_params(params)

    out = domain_classifier_forward(x, prepared)
    out = jax.block_until_ready(out)

    # pure-JAX reference for correctness
    h_ref = jnp.maximum(x @ params["W1"] + params["b1"], 0.0)
    ref = jax.nn.sigmoid(h_ref @ params["W2"] + params["b2"])

    assert out.shape == (batch, output_size)
    assert bool(jnp.allclose(out, ref, atol=1e-5, rtol=1e-5))
    print("KERNEL_OK")
</pallas_src>

<mosaic_0001>
module attributes {stable_mosaic.version = 11 : i64} {
  func.func @_domain_classifier_kernel(%arg0: i32, %arg1: memref<8x128xf32, #tpu.memory_space<vmem>>, %arg2: memref<128x64xf32, #tpu.memory_space<vmem>>, %arg3: memref<1x64xf32, #tpu.memory_space<vmem>>, %arg4: memref<1x64xf32, #tpu.memory_space<vmem>>, %arg5: memref<1x1xf32, #tpu.memory_space<vmem>>, %arg6: memref<8x1xf32, #tpu.memory_space<vmem>>) attributes {dimension_semantics = [#tpu.dimension_semantics<parallel>], iteration_bounds = array<i64: 1>, scalar_prefetch = 0 : i64, scratch_operands = 0 : i64, tpu.core_type = #tpu.core_type<tc>, window_params = [{transform_indices = @transform_0, window_bounds = array<i64: 8, 128>}, {pipeline_mode = #tpu.pipeline_mode<synchronous>, transform_indices = @transform_1, window_bounds = array<i64: 128, 64>}, {pipeline_mode = #tpu.pipeline_mode<synchronous>, transform_indices = @transform_2, window_bounds = array<i64: 1, 64>}, {pipeline_mode = #tpu.pipeline_mode<synchronous>, transform_indices = @transform_3, window_bounds = array<i64: 1, 64>}, {pipeline_mode = #tpu.pipeline_mode<synchronous>, transform_indices = @transform_4, window_bounds = array<i64: 1, 1>}, {transform_indices = @transform_5, window_bounds = array<i64: 8, 1>}]} {
    %c0 = arith.constant 0 : index
    %c0_0 = arith.constant 0 : index
    %0 = vector.load %arg1[%c0, %c0_0] : memref<8x128xf32, #tpu.memory_space<vmem>>, vector<8x128xf32>
    %c0_1 = arith.constant 0 : index
    %c0_2 = arith.constant 0 : index
    %1 = vector.load %arg2[%c0_1, %c0_2] : memref<128x64xf32, #tpu.memory_space<vmem>>, vector<128x64xf32>
    %cst = arith.constant dense<0.000000e+00> : vector<8x64xf32>
    %2 = tpu.matmul %0, %1, %cst {dimension_numbers = #tpu.dot_dimension_numbers<[1], [0], [0], [1], [0, 0, 1, 1], [], []>} : vector<8x128xf32>, vector<128x64xf32>, vector<8x64xf32> -> vector<8x64xf32>
    %c0_3 = arith.constant 0 : index
    %c0_4 = arith.constant 0 : index
    %3 = vector.load %arg3[%c0_3, %c0_4] : memref<1x64xf32, #tpu.memory_space<vmem>>, vector<1x64xf32>
    %4 = vector.broadcast %3 : vector<1x64xf32> to vector<8x64xf32>
    %5 = arith.addf %2, %4 : vector<8x64xf32>
    %cst_5 = arith.constant 0.000000e+00 : f32
    %6 = vector.broadcast %cst_5 : f32 to vector<8x64xf32>
    %7 = arith.maximumf %5, %6 : vector<8x64xf32>
    %c0_6 = arith.constant 0 : index
    %c0_7 = arith.constant 0 : index
    %8 = vector.load %arg4[%c0_6, %c0_7] : memref<1x64xf32, #tpu.memory_space<vmem>>, vector<1x64xf32>
    %9 = vector.broadcast %8 : vector<1x64xf32> to vector<8x64xf32>
    %10 = arith.mulf %7, %9 : vector<8x64xf32>
    %cst_8 = arith.constant dense<0.000000e+00> : vector<8xf32>
    %11 = vector.multi_reduction <add>, %10, %cst_8 [1] : vector<8x64xf32> to vector<8xf32>
    %12 = vector.shape_cast %11 : vector<8xf32> to vector<8x1xf32>
    %c0_9 = arith.constant 0 : index
    %c0_10 = arith.constant 0 : index
    %13 = vector.load %arg5[%c0_9, %c0_10] : memref<1x1xf32, #tpu.memory_space<vmem>>, vector<1x1xf32>
    %14 = vector.broadcast %13 : vector<1x1xf32> to vector<8x1xf32>
    %15 = arith.addf %12, %14 : vector<8x1xf32>
    %cst_11 = arith.constant 0.000000e+00 : f32
    %16 = vector.broadcast %cst_11 : f32 to vector<8x1xf32>
    %17 = arith.subf %16, %15 : vector<8x1xf32>
    %18 = math.exp %17 : vector<8x1xf32>
    %cst_12 = arith.constant 1.000000e+00 : f32
    %19 = vector.broadcast %cst_12 : f32 to vector<8x1xf32>
    %20 = arith.addf %19, %18 : vector<8x1xf32>
    %cst_13 = arith.constant 1.000000e+00 : f32
    %21 = vector.broadcast %cst_13 : f32 to vector<8x1xf32>
    %22 = arith.divf %21, %20 : vector<8x1xf32>
    %c0_14 = arith.constant 0 : index
    %c0_15 = arith.constant 0 : index
    %23 = vector.load %arg6[%c0_14, %c0_15] : memref<8x1xf32, #tpu.memory_space<vmem>>, vector<8x1xf32>
    tpu.vector_store %arg6[%c0_14, %c0_15], %22 {strides = array<i32>} : memref<8x1xf32, #tpu.memory_space<vmem>>, vector<8x1xf32>,
    return
  }
  func.func @transform_0(%arg0: i32) -> (i32, i32) {
    %c0_i32 = arith.constant 0 : i32
    %c0_i32_0 = arith.constant 0 : i32
    return %arg0, %c0_i32 : i32, i32
  }
  func.func @transform_1(%arg0: i32) -> (i32, i32) {
    %c0_i32 = arith.constant 0 : i32
    %c0_i32_0 = arith.constant 0 : i32
    %c0_i32_1 = arith.constant 0 : i32
    return %c0_i32, %c0_i32_0 : i32, i32
  }
  func.func @transform_2(%arg0: i32) -> (i32, i32) {
    %c0_i32 = arith.constant 0 : i32
    %c0_i32_0 = arith.constant 0 : i32
    %c0_i32_1 = arith.constant 0 : i32
    return %c0_i32, %c0_i32_0 : i32, i32
  }
  func.func @transform_3(%arg0: i32) -> (i32, i32) {
    %c0_i32 = arith.constant 0 : i32
    %c0_i32_0 = arith.constant 0 : i32
    %c0_i32_1 = arith.constant 0 : i32
    return %c0_i32, %c0_i32_0 : i32, i32
  }
  func.func @transform_4(%arg0: i32) -> (i32, i32) {
    %c0_i32 = arith.constant 0 : i32
    %c0_i32_0 = arith.constant 0 : i32
    %c0_i32_1 = arith.constant 0 : i32
    return %c0_i32, %c0_i32_0 : i32, i32
  }
  func.func @transform_5(%arg0: i32) -> (i32, i32) {
    %c0_i32 = arith.constant 0 : i32
    %c0_i32_0 = arith.constant 0 : i32
    return %arg0, %c0_i32 : i32, i32
  }
}

</mosaic_0001>

<bundles_post_ra>
// kernel: _forward.1
= control target key start
LH: loop header
LB: loop body
LE: loop exit
PB: predicated region body
PF: predicated region fallthrough
CT: control target
= control target key end

     0   :  { %v235_v0 = vmov 0.0|0.0   ;;  %vm236_vm0 = vmmov 0   ;;  %v237_v4 = vmov 0.0   ;;  %vm125_vm1 = vcmask 523264   ;;  %s331_s1 = inlined_call_operand.vmem [shape: f32[128,64], index: 1, kind: input, shape index: {}]   ;;  %s332_s0 = inlined_call_operand.vmem [shape: f32[8,128], index: 0, kind: input, shape index: {}]   ;;  %s333_s4 = inlined_call_operand.<no memory space> [shape: f32[1,1], index: 4, kind: input, shape index: {}]   ;;  %s334_s2 = inlined_call_operand.vmem [shape: f32[1,64], index: 2, kind: input, shape index: {}]   ;;  %s335_s3 = inlined_call_operand.vmem [shape: f32[1,64], index: 3, kind: input, shape index: {}]   ;;  %s336_s5 = inlined_call_operand.vmem [shape: f32[8,1], index: 5, kind: output, shape index: {}]  }
   0x1   :  { %204 = vmatprep.subr.bf16.mxu0 %v235_v0  ;;  %v23_v1 = vld [vmem:[%s331_s1] sm:$0xff]  ;;  %v24_v2 = vld [vmem:[%s331_s1 + $0x8] sm:$0xff]  ;;  %v25_v3 = vld [vmem:[%s331_s1 + $0x10] sm:$0xff]  ;;  %201 = vmatprep.mubr.msk.f32.mxu0 %vm236_vm0, %v237_v4  ;;  %v10_v27 = vstv %s333_s4  ;;  %vm143_vm2 = vcmask 7168  }
   0x2   :  { %v205_v5 = vpack.c.bf16 %v24_v2, %v23_v1  ;;  %v26_v6 = vld [vmem:[%s331_s1 + $0x18] sm:$0xff]  ;;  %v27_v8 = vld [vmem:[%s331_s1 + $0x20] sm:$0xff]  ;;  %v28_v9 = vld [vmem:[%s331_s1 + $0x28] sm:$0xff]  ;;  %11 = vst [vmem:[#allocation2] sm:$0x1] %v10_v27 }
   0x3   :  { %v208_v7 = vpack.c.bf16 %v26_v6, %v25_v3  ;;  %v211_v10 = vpack.c.bf16 %v28_v9, %v27_v8  ;;  %v29_v11 = vld [vmem:[%s331_s1 + $0x30] sm:$0xff]  ;;  %v30_v12 = vld [vmem:[%s331_s1 + $0x38] sm:$0xff]  ;;  %v31_v14 = vld [vmem:[%s331_s1 + $0x40] sm:$0xff] }
   0x4   :  { %206 = vmatpush3.bf16.msra.mxu0 %v205_v5  ;;  %v214_v13 = vpack.c.bf16 %v30_v12, %v29_v11  ;;  %v32_v15 = vld [vmem:[%s331_s1 + $0x48] sm:$0xff]  ;;  %v33_v17 = vld [vmem:[%s331_s1 + $0x50] sm:$0xff]  ;;  %v34_v18 = vld [vmem:[%s331_s1 + $0x58] sm:$0xff] }
   0x5   :  { %207 = vmatprep.subr.bf16.mxu0 %v235_v0  ;;  %v217_v16 = vpack.c.bf16 %v32_v15, %v31_v14  ;;  %v220_v19 = vpack.c.bf16 %v34_v18, %v33_v17  ;;  %v35_v20 = vld [vmem:[%s331_s1 + $0x60] sm:$0xff]  ;;  %v36_v21 = vld [vmem:[%s331_s1 + $0x68] sm:$0xff]  ;;  %v37_v23 = vld [vmem:[%s331_s1 + $0x70] sm:$0xff] }
   0x6   :  { %v223_v22 = vpack.c.bf16 %v36_v21, %v35_v20  ;;  %v38_v24 = vld [vmem:[%s331_s1 + $0x78] sm:$0xff]  ;;  %v22_v26 = vld [vmem:[%s332_s0] sm:$0xff] }
   0x7   :  { %v226_v25 = vpack.c.bf16 %v38_v24, %v37_v23  ;;  %v149_v28 = vld [vmem:[%s334_s2] ss:$0 sm:$0xff] }
   0x8   :  { %209 = vmatpush3.bf16.msra.mxu0 %v208_v7  ;;  %v150_v32 = vld [vmem:[%s335_s3] ss:$0 sm:$0xff] }
   0x9   :  { %210 = vmatprep.subr.bf16.mxu0 %v235_v0  ;;  %v151_v36 = vld [vmem:[#allocation2] ss:$0 sm:$0xff] }
   0xc   :  { %212 = vmatpush3.bf16.msra.mxu0 %v211_v10 }
   0xd   :  { %213 = vmatprep.subr.bf16.mxu0 %v235_v0 }
  0x10   :  { %215 = vmatpush3.bf16.msra.mxu0 %v214_v13 }
  0x11   :  { %216 = vmatprep.subr.bf16.mxu0 %v235_v0 }
  0x14   :  { %218 = vmatpush3.bf16.msra.mxu0 %v217_v16 }
  0x15   :  { %219 = vmatprep.subr.bf16.mxu0 %v235_v0 }
  0x18   :  { %221 = vmatpush3.bf16.msra.mxu0 %v220_v19 }
  0x19   :  { %222 = vmatprep.subr.bf16.mxu0 %v235_v0 }
  0x1c   :  { %224 = vmatpush3.bf16.msra.mxu0 %v223_v22 }
  0x1d   :  { %225 = vmatprep.subr.bf16.mxu0 %v235_v0 }
  0x20   :  { %227 = vmatpush3.bf16.msra.mxu0 %v226_v25 }
  0x23   :  { %202 = vmatmul.mubr.f32.vlgmr.msra.gmra.mrb[0].mxu0 %v22_v26 }
  0xf6   :  { %v112_v29 = vpop.f32.mrb[0].mxu0 }
  0xf7   :  { %v113_v30 = vadd.f32 %v149_v28, %v112_v29  ;;  %v203_v31 = vpop.f32.mrb[1].mxu0 }
  0xf9   :  { %v116_v33 = vmax.f32 %v113_v30, 0.0 }
  0xfb   :  { %v124_v34 = vmul.f32 %v150_v32, %v116_v33 }
  0xfd   :  { %v126_v35 = vsel %vm125_vm1, %v124_v34, 0.0 }
  0xfe   :  { %127 = vadd.xlane.f32.xlu0 %v126_v35 }
 0x18b   :  { %v128_v37 = vpop.xlane.xlu0 %127 }
 0x18c   :  { %v136_v38 = vadd.f32 %v151_v36, %v128_v37 }
 0x18e   :  { %v137_v39 = vsub.f32 0.0, %v136_v38 }
 0x190   :  { %v138_v40 = vmul.f32 1.442695, %v137_v39 }
 0x192   :  { %231 = vpow2.f32 %v138_v40 }
 0x19c   :  { %v232_v41 = vpop.eup %231 }
 0x19d   :  { %v140_v42 = vadd.f32 1.0, %v232_v41 }
 0x19f   :  { %233 = vrcp.f32 %v140_v42 }
 0x1a9   :  { %v234_v43 = vpop.eup %233 }
 0x1aa   :  { %144 = vst.msk [vmem:[%s336_s5] sm:$0xff] %vm143_vm2, %v234_v43 }

</bundles_post_ra>
